<compile_context>
chip_gen: v6e
topology: v6e:2x2x1
jax: 0.10.0
libtpu: 0.0.40
codegen_flags: <defaults>
</compile_context>

<pallas_src>
import jax
import jax.numpy as jnp
from jax.experimental import pallas as pl
from jax.experimental.pallas import tpu as pltpu

_LANE = 128


def _round_up(x, m):
    return ((x + m - 1) // m) * m


def _cdiv(a, b):
    return -(-a // b)


# ---------------------------------------------------------------------------
# Kernel: one batch tile per grid step.  Weights/biases are resident blocks.
# Writes logits only (softmax is done in the wrapper on the sliced logits).
# ---------------------------------------------------------------------------
def actor_kernel(x_ref, w1_ref, b1_ref, w2_ref, b2_ref, w3_ref, b3_ref,
                 logits_ref):
    # f32 x tile -> bf16 in VMEM right before the MXU (VPU cast, hidden by DMA)
    x = x_ref[...].astype(w1_ref.dtype)                          # (TB, S) bf16

    # fc1 + ReLU  (MXU matmul, f32 accumulate; padded hidden lanes stay 0)
    h1 = jnp.dot(x, w1_ref[...], preferred_element_type=jnp.float32)
    h1 = jnp.maximum(h1 + b1_ref[...], 0.0)                      # (TB, HP) f32

    # fc2 + ReLU
    h2 = jnp.dot(h1.astype(w2_ref.dtype), w2_ref[...],
                 preferred_element_type=jnp.float32)
    h2 = jnp.maximum(h2 + b2_ref[...], 0.0)                      # (TB, HP) f32

    # fc3 -> logits (padded action lanes carry a 0 bias; never consumed)
    logits = jnp.dot(h2.astype(w3_ref.dtype), w3_ref[...],
                     preferred_element_type=jnp.float32)
    logits_ref[...] = (logits + b3_ref[...]).astype(logits_ref.dtype)


# ---------------------------------------------------------------------------
# Param padding: lane-dense hidden/action dims; weights bf16, biases f32.
# state_dim is left unpadded (consumed as a full-extent block dimension).
# ---------------------------------------------------------------------------
def prepare_params(params, compute_dtype=jnp.bfloat16):
    w1, b1, w2, b2, w3, b3 = params
    S, H = w1.shape
    A = w3.shape[1]
    HP, AP = _round_up(H, _LANE), _round_up(A, _LANE)

    w1p = jnp.zeros((S, HP), jnp.float32).at[:, :H].set(w1).astype(compute_dtype)
    b1p = jnp.zeros((1, HP), jnp.float32).at[:, :H].set(b1)
    w2p = jnp.zeros((HP, HP), jnp.float32).at[:H, :H].set(w2).astype(compute_dtype)
    b2p = jnp.zeros((1, HP), jnp.float32).at[:, :H].set(b2)
    w3p = jnp.zeros((HP, AP), jnp.float32).at[:H, :A].set(w3).astype(compute_dtype)
    b3p = jnp.zeros((1, AP), jnp.float32).at[:, :A].set(b3)
    return (w1p, b1p, w2p, b2p, w3p, b3p), (S, H, A, HP, AP)


# ---------------------------------------------------------------------------
# Wrapper
# ---------------------------------------------------------------------------
def actor_forward(x, params, *, compute_dtype=jnp.bfloat16, max_batch_tile=1024):
    """x: (B, C, H, W) float32 NCHW observation.  Returns (probs, logits),
    each (B, action_dim) float32."""
    w1 = params[0]
    w3 = params[4]
    state_dim = w1.shape[0]
    action_dim = w3.shape[1]

    (w1p, b1p, w2p, b2p, w3p, b3p), (S, _, A, HP, AP) = prepare_params(
        params, compute_dtype)

    B = x.shape[0]
    x2d = x.reshape(B, -1)                    # x.view(-1, in_features): no copy
    assert x2d.shape[1] == state_dim

    # Batch tile: multiple of the f32 sublane pack (8 rows/vreg).  Prefer >= 2
    # grid steps so the "parallel" batch axis shards across both v7x
    # TensorCores; cap at max_batch_tile (1024 default fits v5e's 16 MiB scoped
    # VMEM default and v7x's 64 MiB physical VMEM with headroom).  The ragged
    # last tile is masked by Pallas (grid = cdiv), no batch padding in HBM.
    row_tile = 8
    TB = max(row_tile, min(max_batch_tile, _round_up(_cdiv(B, 2), row_tile)))
    if B <= TB:
        TB = B                 # single full-extent block: no boundary masking
    nb = _cdiv(B, TB)

    # Explicit VMEM budget: double-buffered x / logits streams + resident
    # weights.  (Resident blocks could use pipeline_mode=pl.Buffered(1) to drop
    # the redundant second buffer (~0.3 MiB); omitted — the budget fits easily.)
    x_bytes = jnp.dtype(x2d.dtype).itemsize
    w_bytes = jnp.dtype(compute_dtype).itemsize
    weight_bytes = (S * HP + HP * HP + HP * AP) * w_bytes + 3 * HP * 4
    vmem_needed = (2 * TB * S * x_bytes      # x tiles (double-buffered)
                   + 2 * TB * AP * 4         # logits tiles (double-buffered)
                   + 2 * weight_bytes)       # resident weights/biases
    vmem_limit = int(min(vmem_needed + (4 << 20), 30 << 20))   # v7x-safe cap

    cost = pl.CostEstimate(
        flops=2 * B * (S * HP + HP * HP + HP * AP),
        transcendentals=0,
        bytes_accessed=B * S * x_bytes + weight_bytes + B * AP * 4)

    row_spec = lambda shape: pl.BlockSpec(shape, lambda i: (i, 0))   # streamed
    rep_spec = lambda shape: pl.BlockSpec(shape, lambda i: (0, 0))   # resident

    logits_padded = pl.pallas_call(
        actor_kernel,
        out_shape=jax.ShapeDtypeStruct((B, AP), jnp.float32),
        grid=(nb,),
        in_specs=[
            row_spec((TB, S)),
            rep_spec((S, HP)), rep_spec((1, HP)),
            rep_spec((HP, HP)), rep_spec((1, HP)),
            rep_spec((HP, AP)), rep_spec((1, AP)),
        ],
        out_specs=row_spec((TB, AP)),
        compiler_params=pltpu.CompilerParams(
            dimension_semantics=("parallel",),
            vmem_limit_bytes=vmem_limit),
        cost_estimate=cost,
    )(x2d, w1p, b1p, w2p, b2p, w3p, b3p)

    logits = logits_padded[:, :action_dim]
    # Exact softmax on the tiny (B, action_dim) slice — matches F.softmax and
    # avoids writing a second full (TB, 128) f32 stream from the kernel.
    probs = jax.nn.softmax(logits, axis=-1)
    return probs, logits


# ---------------------------------------------------------------------------
# Init + pure-JAX reference of the PyTorch forward (non-KG branch).
# ---------------------------------------------------------------------------
def init_params(key, state_dim, hidden, action_dim):
    """torch.nn.Linear-style init: U(-1/sqrt(fan_in), 1/sqrt(fan_in)).
    Weights stored as (in, out), i.e. already transposed for x @ W."""
    keys = jax.random.split(key, 6)

    def linear(kw, kb, fan_in, fan_out):
        bound = 1.0 / jnp.sqrt(jnp.float32(fan_in))
        w = jax.random.uniform(kw, (fan_in, fan_out), jnp.float32, -bound, bound)
        b = jax.random.uniform(kb, (1, fan_out), jnp.float32, -bound, bound)
        return w, b

    w1, b1 = linear(keys[0], keys[1], state_dim, hidden)
    w2, b2 = linear(keys[2], keys[3], hidden, hidden)
    w3, b3 = linear(keys[4], keys[5], hidden, action_dim)
    return (w1, b1, w2, b2, w3, b3)


def reference_forward(x, params):
    w1, b1, w2, b2, w3, b3 = params
    x2d = x.reshape(x.shape[0], -1).astype(jnp.float32)
    h1 = jnp.maximum(x2d @ w1 + b1, 0.0)
    h2 = jnp.maximum(h1 @ w2 + b2, 0.0)
    logits = h2 @ w3 + b3
    probs = jax.nn.softmax(logits, axis=-1)
    return probs, logits


if __name__ == "__main__":
    key = jax.random.PRNGKey(0)
    k_x, k_p = jax.random.split(key)

    # Small shapes consistent with the module: NCHW observation flattened to
    # state_dim = C*H*W; 7 actions (multigrid), hidden = 64 (from __init__).
    B, C, H, W = 2, 4, 16, 16
    state_dim = C * H * W          # 1024
    hidden = 64
    action_dim = 7

    x = jax.random.normal(k_x, (B, C, H, W), jnp.float32)
    params = init_params(k_p, state_dim, hidden, action_dim)

    fwd = jax.jit(actor_forward)
    probs, logits = fwd(x, params)
    probs = jax.block_until_ready(probs)
    logits = jax.block_until_ready(logits)

    # correctness check against pure-JAX f32 reference (kernel uses bf16
    # matmul inputs with f32 accumulation, hence the loosened tolerances)
    ref_probs, ref_logits = reference_forward(x, params)
    assert probs.shape == (B, action_dim) and logits.shape == (B, action_dim)
    assert jnp.allclose(logits, ref_logits, atol=5e-2, rtol=5e-2), (
        float(jnp.max(jnp.abs(logits - ref_logits))))
    assert jnp.allclose(probs, ref_probs, atol=2e-2, rtol=2e-2), (
        float(jnp.max(jnp.abs(probs - ref_probs))))
    assert jnp.allclose(jnp.sum(probs, axis=-1), 1.0, atol=1e-5)

    print("KERNEL_OK")
</pallas_src>

<mosaic_0001>
module attributes {stable_mosaic.version = 11 : i64} {
  func.func @actor_kernel(%arg0: i32, %arg1: memref<2x1024xf32, #tpu.memory_space<vmem>>, %arg2: memref<1024x128xbf16, #tpu.memory_space<vmem>>, %arg3: memref<1x128xf32, #tpu.memory_space<vmem>>, %arg4: memref<128x128xbf16, #tpu.memory_space<vmem>>, %arg5: memref<1x128xf32, #tpu.memory_space<vmem>>, %arg6: memref<128x128xbf16, #tpu.memory_space<vmem>>, %arg7: memref<1x128xf32, #tpu.memory_space<vmem>>, %arg8: memref<2x128xf32, #tpu.memory_space<vmem>>) attributes {dimension_semantics = [#tpu.dimension_semantics<parallel>], iteration_bounds = array<i64: 1>, scalar_prefetch = 0 : i64, scratch_operands = 0 : i64, tpu.core_type = #tpu.core_type<tc>, window_params = [{transform_indices = @transform_0, window_bounds = array<i64: 2, 1024>}, {pipeline_mode = #tpu.pipeline_mode<synchronous>, transform_indices = @transform_1, window_bounds = array<i64: 1024, 128>}, {pipeline_mode = #tpu.pipeline_mode<synchronous>, transform_indices = @transform_2, window_bounds = array<i64: 1, 128>}, {pipeline_mode = #tpu.pipeline_mode<synchronous>, transform_indices = @transform_3, window_bounds = array<i64: 128, 128>}, {pipeline_mode = #tpu.pipeline_mode<synchronous>, transform_indices = @transform_4, window_bounds = array<i64: 1, 128>}, {pipeline_mode = #tpu.pipeline_mode<synchronous>, transform_indices = @transform_5, window_bounds = array<i64: 128, 128>}, {pipeline_mode = #tpu.pipeline_mode<synchronous>, transform_indices = @transform_6, window_bounds = array<i64: 1, 128>}, {transform_indices = @transform_7, window_bounds = array<i64: 2, 128>}]} {
    %c0 = arith.constant 0 : index
    %c0_0 = arith.constant 0 : index
    %0 = vector.load %arg1[%c0, %c0_0] : memref<2x1024xf32, #tpu.memory_space<vmem>>, vector<2x1024xf32>
    %1 = arith.truncf %0 : vector<2x1024xf32> to vector<2x1024xbf16>
    %c0_1 = arith.constant 0 : index
    %c0_2 = arith.constant 0 : index
    %2 = vector.load %arg2[%c0_1, %c0_2] : memref<1024x128xbf16, #tpu.memory_space<vmem>>, vector<1024x128xbf16>
    %cst = arith.constant dense<0.000000e+00> : vector<2x128xf32>
    %3 = tpu.matmul %1, %2, %cst {dimension_numbers = #tpu.dot_dimension_numbers<[1], [0], [0], [1], [0, 0, 1, 1], [], []>} : vector<2x1024xbf16>, vector<1024x128xbf16>, vector<2x128xf32> -> vector<2x128xf32>
    %c0_3 = arith.constant 0 : index
    %c0_4 = arith.constant 0 : index
    %4 = vector.load %arg3[%c0_3, %c0_4] : memref<1x128xf32, #tpu.memory_space<vmem>>, vector<1x128xf32>
    %5 = vector.broadcast %4 : vector<1x128xf32> to vector<2x128xf32>
    %6 = arith.addf %3, %5 : vector<2x128xf32>
    %cst_5 = arith.constant 0.000000e+00 : f32
    %7 = vector.broadcast %cst_5 : f32 to vector<2x128xf32>
    %8 = arith.maximumf %6, %7 : vector<2x128xf32>
    %9 = arith.truncf %8 : vector<2x128xf32> to vector<2x128xbf16>
    %c0_6 = arith.constant 0 : index
    %c0_7 = arith.constant 0 : index
    %10 = vector.load %arg4[%c0_6, %c0_7] : memref<128x128xbf16, #tpu.memory_space<vmem>>, vector<128x128xbf16>
    %cst_8 = arith.constant dense<0.000000e+00> : vector<2x128xf32>
    %11 = tpu.matmul %9, %10, %cst_8 {dimension_numbers = #tpu.dot_dimension_numbers<[1], [0], [0], [1], [0, 0, 1, 1], [], []>} : vector<2x128xbf16>, vector<128x128xbf16>, vector<2x128xf32> -> vector<2x128xf32>
    %c0_9 = arith.constant 0 : index
    %c0_10 = arith.constant 0 : index
    %12 = vector.load %arg5[%c0_9, %c0_10] : memref<1x128xf32, #tpu.memory_space<vmem>>, vector<1x128xf32>
    %13 = vector.broadcast %12 : vector<1x128xf32> to vector<2x128xf32>
    %14 = arith.addf %11, %13 : vector<2x128xf32>
    %cst_11 = arith.constant 0.000000e+00 : f32
    %15 = vector.broadcast %cst_11 : f32 to vector<2x128xf32>
    %16 = arith.maximumf %14, %15 : vector<2x128xf32>
    %17 = arith.truncf %16 : vector<2x128xf32> to vector<2x128xbf16>
    %c0_12 = arith.constant 0 : index
    %c0_13 = arith.constant 0 : index
    %18 = vector.load %arg6[%c0_12, %c0_13] : memref<128x128xbf16, #tpu.memory_space<vmem>>, vector<128x128xbf16>
    %cst_14 = arith.constant dense<0.000000e+00> : vector<2x128xf32>
    %19 = tpu.matmul %17, %18, %cst_14 {dimension_numbers = #tpu.dot_dimension_numbers<[1], [0], [0], [1], [0, 0, 1, 1], [], []>} : vector<2x128xbf16>, vector<128x128xbf16>, vector<2x128xf32> -> vector<2x128xf32>
    %c0_15 = arith.constant 0 : index
    %c0_16 = arith.constant 0 : index
    %20 = vector.load %arg7[%c0_15, %c0_16] : memref<1x128xf32, #tpu.memory_space<vmem>>, vector<1x128xf32>
    %21 = vector.broadcast %20 : vector<1x128xf32> to vector<2x128xf32>
    %22 = arith.addf %19, %21 : vector<2x128xf32>
    %c0_17 = arith.constant 0 : index
    %c0_18 = arith.constant 0 : index
    %23 = vector.load %arg8[%c0_17, %c0_18] : memref<2x128xf32, #tpu.memory_space<vmem>>, vector<2x128xf32>
    tpu.vector_store %arg8[%c0_17, %c0_18], %22 {strides = array<i32>} : memref<2x128xf32, #tpu.memory_space<vmem>>, vector<2x128xf32>,
    return
  }
  func.func @transform_0(%arg0: i32) -> (i32, i32) {
    %c0_i32 = arith.constant 0 : i32
    %c0_i32_0 = arith.constant 0 : i32
    return %arg0, %c0_i32 : i32, i32
  }
  func.func @transform_1(%arg0: i32) -> (i32, i32) {
    %c0_i32 = arith.constant 0 : i32
    %c0_i32_0 = arith.constant 0 : i32
    %c0_i32_1 = arith.constant 0 : i32
    return %c0_i32, %c0_i32_0 : i32, i32
  }
  func.func @transform_2(%arg0: i32) -> (i32, i32) {
    %c0_i32 = arith.constant 0 : i32
    %c0_i32_0 = arith.constant 0 : i32
    %c0_i32_1 = arith.constant 0 : i32
    return %c0_i32, %c0_i32_0 : i32, i32
  }
  func.func @transform_3(%arg0: i32) -> (i32, i32) {
    %c0_i32 = arith.constant 0 : i32
    %c0_i32_0 = arith.constant 0 : i32
    %c0_i32_1 = arith.constant 0 : i32
    return %c0_i32, %c0_i32_0 : i32, i32
  }
  func.func @transform_4(%arg0: i32) -> (i32, i32) {
    %c0_i32 = arith.constant 0 : i32
    %c0_i32_0 = arith.constant 0 : i32
    %c0_i32_1 = arith.constant 0 : i32
    return %c0_i32, %c0_i32_0 : i32, i32
  }
  func.func @transform_5(%arg0: i32) -> (i32, i32) {
    %c0_i32 = arith.constant 0 : i32
    %c0_i32_0 = arith.constant 0 : i32
    %c0_i32_1 = arith.constant 0 : i32
    return %c0_i32, %c0_i32_0 : i32, i32
  }
  func.func @transform_6(%arg0: i32) -> (i32, i32) {
    %c0_i32 = arith.constant 0 : i32
    %c0_i32_0 = arith.constant 0 : i32
    %c0_i32_1 = arith.constant 0 : i32
    return %c0_i32, %c0_i32_0 : i32, i32
  }
  func.func @transform_7(%arg0: i32) -> (i32, i32) {
    %c0_i32 = arith.constant 0 : i32
    %c0_i32_0 = arith.constant 0 : i32
    return %arg0, %c0_i32 : i32, i32
  }
}

</mosaic_0001>

<bundles_post_ra>
// kernel: actor_forward.1
= control target key start
LH: loop header
LB: loop body
LE: loop exit
PB: predicated region body
PF: predicated region fallthrough
CT: control target
= control target key end

     0   :  { %v1305_v22 = vmov 1983009808   ;;  %v35_v24 = vlaneseq  ;;  %vm1307_vm0 = vmmov 0   ;;  %s1636_s1 = inlined_call_operand.vmem [shape: bf16[1024,128], index: 1, kind: input, shape index: {}]   ;;  %s1637_s0 = inlined_call_operand.vmem [shape: f32[2,1024], index: 0, kind: input, shape index: {}]   ;;  %s1638_s3 = inlined_call_operand.vmem [shape: bf16[128,128], index: 3, kind: input, shape index: {}]   ;;  %s1639_s5 = inlined_call_operand.vmem [shape: bf16[128,128], index: 5, kind: input, shape index: {}]   ;;  %s1640_s2 = inlined_call_operand.vmem [shape: f32[1,128], index: 2, kind: input, shape index: {}]   ;;  %s1641_s4 = inlined_call_operand.vmem [shape: f32[1,128], index: 4, kind: input, shape index: {}]   ;;  %s1642_s6 = inlined_call_operand.vmem [shape: f32[1,128], index: 6, kind: input, shape index: {}]   ;;  %s1643_s7 = inlined_call_operand.vmem [shape: f32[2,128], index: 7, kind: output, shape index: {}]  }
   0x1   :  { %v1223_v0 = vld [vmem:[%s1636_s1 + $0x78] sm:$0xff]   ;;  %v1227_v4 = vld [vmem:[%s1636_s1 + $0x70] sm:$0xff]   ;;  %v1231_v8 = vld [vmem:[%s1636_s1 + $0x68] sm:$0xff]   ;;  %v33_v23 = vunpack.c.l.s4 %v1305_v22 }
   0x2   :  { %v1224_v1 = vld [vmem:[%s1636_s1 + $0xf8] sm:$0xff]   ;;  %1074 = vmatprep.subr.bf16.mxu0 %v1223_v0  ;;  %v1228_v5 = vld [vmem:[%s1636_s1 + $0xf0] sm:$0xff]   ;;  %v1232_v9 = vld [vmem:[%s1636_s1 + $0xe8] sm:$0xff]   ;;  %v36_v30 = vshrl.u32 %v35_v24, 7 }
   0x3   :  { %v1225_v2 = vld [vmem:[%s1636_s1 + $0x38] sm:$0xff]   ;;  %1096 = vmatprep.subr.bf16.mxu1 %v1224_v1  ;;  %v1229_v6 = vld [vmem:[%s1636_s1 + $0x30] sm:$0xff]   ;;  %v1233_v10 = vld [vmem:[%s1636_s1 + $0x28] sm:$0xff]   ;;  %v34_v29 = vunpack.c.0.s8 %v33_v23 }
   0x4   :  { %v1226_v3 = vld [vmem:[%s1636_s1 + $0xb8] sm:$0xff]   ;;  %1075 = vmatpush3.bf16.msra.mxu0 %v1225_v2  ;;  %v1230_v7 = vld [vmem:[%s1636_s1 + $0xb0] sm:$0xff]   ;;  %v1234_v11 = vld [vmem:[%s1636_s1 + $0xa8] sm:$0xff]  }
   0x5   :  { %1097 = vmatpush3.bf16.msra.mxu1 %v1226_v3  ;;  %1076 = vmatprep.subr.bf16.mxu0 %v1227_v4  ;;  %v1235_v12 = vld [vmem:[%s1636_s1 + $0x60] sm:$0xff]   ;;  %v1239_v16 = vld [vmem:[%s1636_s1 + $0x58] sm:$0xff]   ;;  %v1243_v20 = vld [vmem:[%s1636_s1 + $0x50] sm:$0xff]   ;;  %v37_v35 = vsub.s32 %v34_v29, %v36_v30 }
   0x6   :  { %1098 = vmatprep.subr.bf16.mxu1 %v1228_v5  ;;  %v1236_v13 = vld [vmem:[%s1636_s1 + $0xe0] sm:$0xff]   ;;  %v1240_v17 = vld [vmem:[%s1636_s1 + $0xd8] sm:$0xff]   ;;  %v1244_v21 = vld [vmem:[%s1636_s1 + $0xd0] sm:$0xff]  }
   0x7   :  { %v1237_v14 = vld [vmem:[%s1636_s1 + $0x20] sm:$0xff]   ;;  %v1241_v18 = vld [vmem:[%s1636_s1 + $0x18] sm:$0xff]   ;;  %v1245_v25 = vld [vmem:[%s1636_s1 + $0x10] sm:$0xff]  }
   0x8   :  { %1077 = vmatpush3.bf16.msra.mxu0 %v1229_v6  ;;  %v1238_v15 = vld [vmem:[%s1636_s1 + $0xa0] sm:$0xff]   ;;  %v1242_v19 = vld [vmem:[%s1636_s1 + $0x98] sm:$0xff]   ;;  %v1246_v26 = vld [vmem:[%s1636_s1 + $0x90] sm:$0xff]  }
   0x9   :  { %1099 = vmatpush3.bf16.msra.mxu1 %v1230_v7  ;;  %1078 = vmatprep.subr.bf16.mxu0 %v1231_v8  ;;  %v1247_v27 = vld [vmem:[%s1636_s1 + $0x48] sm:$0xff]   ;;  %v1251_v33 = vld [vmem:[%s1636_s1 + $0x40] sm:$0xff]   ;;  %v1257_v43 = vld [vmem:[%s1636_s1 + $0x178] sm:$0xff]  }
   0xa   :  { %1100 = vmatprep.subr.bf16.mxu1 %v1232_v9  ;;  %v1248_v28 = vld [vmem:[%s1636_s1 + $0xc8] sm:$0xff]   ;;  %v1252_v34 = vld [vmem:[%s1636_s1 + $0xc0] sm:$0xff]   ;;  %v1258_v45 = vld [vmem:[%s1636_s1 + $0x1f8] sm:$0xff]  }
   0xb   :  { %v1249_v31 = vld [vmem:[%s1636_s1 + $0x8] sm:$0xff]   ;;  %v1253_v36 = vld [vmem:[%s1636_s1] sm:$0xff]   ;;  %v1259_v53 = vld [vmem:[%s1636_s1 + $0x138] sm:$0xff]  }
   0xc   :  { %1079 = vmatpush3.bf16.msra.mxu0 %v1233_v10  ;;  %v1250_v32 = vld [vmem:[%s1636_s1 + $0x88] sm:$0xff]   ;;  %v1254_v37 = vld [vmem:[%s1636_s1 + $0x80] sm:$0xff]   ;;  %v1261_v55 = vld [vmem:[%s1636_s1 + $0x170] sm:$0xff]  }
   0xd   :  { %1101 = vmatpush3.bf16.msra.mxu1 %v1234_v11  ;;  %1080 = vmatprep.subr.bf16.mxu0 %v1235_v12  ;;  %v27_v38 = vld [vmem:[%s1637_s0] sm:$0xff]  ;;  %v28_v39 = vld [vmem:[%s1637_s0 + $0x8] sm:$0xff]  ;;  %v1260_v58 = vld [vmem:[%s1636_s1 + $0x1b8] sm:$0xff]  }
   0xe   :  { %1102 = vmatprep.subr.bf16.mxu1 %v1236_v13  ;;  %v38_v40 = vrot.slane %v27_v38, %v37_v35  ;;  %v48_v41 = vcombine.high %v28_v39, %v28_v39  ;;  %v31_v42 = vcombine.high %v27_v38, %v27_v38  ;;  %v1453_v44 = vrot.slane %v28_v39, %v37_v35  ;;  %v1262_v60 = vld [vmem:[%s1636_s1 + $0x1f0] sm:$0xff]   ;;  %v1265_v63 = vld [vmem:[%s1636_s1 + $0x168] sm:$0xff]   ;;  %v1269_v3 = vld [vmem:[%s1636_s1 + $0x160] sm:$0xff]  }
   0xf   :  { %v1263_v62 = vld [vmem:[%s1636_s1 + $0x130] sm:$0xff]   ;;  %v1266_v1 = vld [vmem:[%s1636_s1 + $0x1e8] sm:$0xff]   ;;  %v1270_v5 = vld [vmem:[%s1636_s1 + $0x1e0] sm:$0xff]  }
  0x10   :  { %1081 = vmatpush3.bf16.msra.mxu0 %v1237_v14  ;;  %v46_v46 = vcombine.high %v38_v40, %v38_v40  ;;  %v45_v47 = vrot.slane %v31_v42, %v37_v35  ;;  %v63_v48 = vcombine.high %v1453_v44, %v1453_v44  ;;  %v73_v49 = vpack.c.bf16 %v38_v40, %v38_v40  ;;  %v1264_v0 = vld [vmem:[%s1636_s1 + $0x1b0] sm:$0xff]   ;;  %v1267_v2 = vld [vmem:[%s1636_s1 + $0x128] sm:$0xff]   ;;  %v1271_v6 = vld [vmem:[%s1636_s1 + $0x120] sm:$0xff]  }
  0x11   :  { %1103 = vmatpush3.bf16.msra.mxu1 %v1238_v15  ;;  %1082 = vmatprep.subr.bf16.mxu0 %v1239_v16  ;;  %v1460_v50 = vrot.slane %v48_v41, %v37_v35  ;;  %v1268_v4 = vld [vmem:[%s1636_s1 + $0x1a8] sm:$0xff]   ;;  %v1273_v7 = vld [vmem:[%s1636_s1 + $0x158] sm:$0xff]   ;;  %v1272_v8 = vld [vmem:[%s1636_s1 + $0x1a0] sm:$0xff]   ;;  %v77_v24 = vpack.c.bf16 %v1453_v44, %v1453_v44 }
  0x12   :  { %1104 = vmatprep.subr.bf16.mxu1 %v1240_v17  ;;  %v74_v51 = vpack.c.bf16 %v46_v46, %v46_v46  ;;  %v47_v52 = vcombine.high %v45_v47, %v45_v47  ;;  %v75_v54 = vpack.c.bf16 %v45_v47, %v45_v47  ;;  %v78_v59 = vpack.c.bf16 %v63_v48, %v63_v48  ;;  %v1274_v9 = vld [vmem:[%s1636_s1 + $0x1d8] sm:$0xff]   ;;  %v1277_v11 = vld [vmem:[%s1636_s1 + $0x150] sm:$0xff]   ;;  %v1281_v15 = vld [vmem:[%s1636_s1 + $0x148] sm:$0xff]  }
  0x13   :  { %v64_v56 = vcombine.high %v1460_v50, %v1460_v50  ;;  %v1275_v10 = vld [vmem:[%s1636_s1 + $0x118] sm:$0xff]   ;;  %v1278_v13 = vld [vmem:[%s1636_s1 + $0x1d0] sm:$0xff]   ;;  %v1282_v17 = vld [vmem:[%s1636_s1 + $0x1c8] sm:$0xff]  }
  0x14   :  { %1083 = vmatpush3.bf16.msra.mxu0 %v1241_v18  ;;  %632 = vmatprep.mubr.bf16.mxu0 %v74_v51  ;;  %v76_v57 = vpack.c.bf16 %v47_v52, %v47_v52  ;;  %v1276_v12 = vld [vmem:[%s1636_s1 + $0x198] sm:$0xff]   ;;  %v1279_v14 = vld [vmem:[%s1636_s1 + $0x110] sm:$0xff]   ;;  %v1283_v18 = vld [vmem:[%s1636_s1 + $0x108] sm:$0xff]  }
  0x15   :  { %1105 = vmatpush3.bf16.msra.mxu1 %v1242_v19  ;;  %1084 = vmatprep.subr.bf16.mxu0 %v1243_v20  ;;  %v80_v61 = vpack.c.bf16 %v64_v56, %v64_v56  ;;  %v1280_v16 = vld [vmem:[%s1636_s1 + $0x190] sm:$0xff]   ;;  %v1285_v19 = vld [vmem:[%s1636_s1 + $0x140] sm:$0xff]   ;;  %v1284_v20 = vld [vmem:[%s1636_s1 + $0x188] sm:$0xff]  }
  0x16   :  { %1106 = vmatprep.subr.bf16.mxu1 %v1244_v21  ;;  %672 = vmatprep.mubr.bf16.mxu1 %v76_v57  ;;  %v1286_v21 = vld [vmem:[%s1636_s1 + $0x1c0] sm:$0xff]   ;;  %v1291_v29 = vld [vmem:[%s1638_s3 + $0x28] sm:$0xff]   ;;  %v1297_v35 = vld [vmem:[%s1639_s5 + $0x38] sm:$0xff]  }
  0x17   :  { %v1287_v22 = vld [vmem:[%s1636_s1 + $0x100] sm:$0xff]   ;;  %v1301_v39 = vld [vmem:[%s1639_s5 + $0x18] sm:$0xff]   ;;  %v1302_v40 = vld [vmem:[%s1639_s5 + $0x10] sm:$0xff]  }
  0x18   :  { %1085 = vmatpush3.bf16.msra.mxu0 %v1245_v25  ;;  %v1288_v23 = vld [vmem:[%s1636_s1 + $0x180] sm:$0xff]   ;;  %v79_v25 = vpack.c.bf16 %v1460_v50, %v1460_v50 }
  0x19   :  { %1107 = vmatpush3.bf16.msra.mxu1 %v1246_v26  ;;  %1086 = vmatprep.subr.bf16.mxu0 %v1247_v27  ;;  %v1306_v26 = vmov 0.0   ;;  %v1289_v27 = vld [vmem:[%s1638_s3 + $0x38] sm:$0xff]   ;;  %v1292_v30 = vld [vmem:[%s1638_s3 + $0x20] sm:$0xff]  }
  0x1a   :  { %1108 = vmatprep.subr.bf16.mxu1 %v1248_v28  ;;  %v1290_v28 = vld [vmem:[%s1638_s3 + $0x30] sm:$0xff]   ;;  %v1300_v38 = vld [vmem:[%s1639_s5 + $0x20] sm:$0xff]  }
  0x1b   :  { %v991_v50 = vld [vmem:[%s1640_s2] ss:$0 sm:$0xff] }
  0x1c   :  { %1087 = vmatpush3.bf16.msra.mxu0 %v1249_v31  ;;  %v1293_v31 = vld [vmem:[%s1638_s3 + $0x18] sm:$0xff]  }
  0x1d   :  { %1109 = vmatpush3.bf16.msra.mxu1 %v1250_v32  ;;  %1088 = vmatprep.subr.bf16.mxu0 %v1251_v33  ;;  %v1294_v32 = vld [vmem:[%s1638_s3 + $0x10] sm:$0xff]   ;;  %v1295_v33 = vld [vmem:[%s1638_s3 + $0x8] sm:$0xff]  }
  0x1e   :  { %1110 = vmatprep.subr.bf16.mxu1 %v1252_v34  ;;  %v1296_v34 = vld [vmem:[%s1638_s3] sm:$0xff]  }
  0x20   :  { %1089 = vmatpush3.bf16.msra.mxu0 %v1253_v36  ;;  %v1298_v36 = vld [vmem:[%s1639_s5 + $0x30] sm:$0xff]  }
  0x21   :  { %1111 = vmatpush3.bf16.msra.mxu1 %v1254_v37  ;;  %1118 = vmatprep.subr.bf16.mxu0 %v1257_v43  ;;  %v1299_v37 = vld [vmem:[%s1639_s5 + $0x28] sm:$0xff]  }
  0x22   :  { %1140 = vmatprep.subr.bf16.mxu1 %v1258_v45 }
  0x23   :  { %633 = vmatmul.mubr.bf16.vlgmr.msra.gmra.mxu0 %v73_v49 }
  0x24   :  { %1119 = vmatpush3.bf16.msra.mxu0 %v1259_v53  ;;  %673 = vmatmul.mubr.bf16.vlgmr.msra.gmra.mxu1 %v75_v54 }
  0x25   :  { %1120 = vmatprep.subr.bf16.mxu0 %v1261_v55  ;;  %1141 = vmatpush3.bf16.msra.mxu1 %v1260_v58 }
  0x26   :  { %712 = vmatprep.mubr.bf16.mxu0 %v78_v59  ;;  %1142 = vmatprep.subr.bf16.mxu1 %v1262_v60 }
  0x27   :  { %752 = vmatprep.mubr.bf16.mxu1 %v80_v61 }
  0x28   :  { %1121 = vmatpush3.bf16.msra.mxu0 %v1263_v62 }
  0x29   :  { %1122 = vmatprep.subr.bf16.mxu0 %v1265_v63  ;;  %1143 = vmatpush3.bf16.msra.mxu1 %v1264_v0 }
  0x2a   :  { %1144 = vmatprep.subr.bf16.mxu1 %v1266_v1 }
  0x2c   :  { %1123 = vmatpush3.bf16.msra.mxu0 %v1267_v2 }
  0x2d   :  { %1124 = vmatprep.subr.bf16.mxu0 %v1269_v3  ;;  %1145 = vmatpush3.bf16.msra.mxu1 %v1268_v4  ;;  %v1303_v4 = vld [vmem:[%s1639_s5 + $0x8] sm:$0xff]  }
  0x2e   :  { %1146 = vmatprep.subr.bf16.mxu1 %v1270_v5  ;;  %v1304_v5 = vld [vmem:[%s1639_s5] sm:$0xff]  }
  0x30   :  { %1125 = vmatpush3.bf16.msra.mxu0 %v1271_v6  ;;  %v1056_v6 = vld [vmem:[%s1641_s4] ss:$0 sm:$0xff] }
  0x31   :  { %1126 = vmatprep.subr.bf16.mxu0 %v1273_v7  ;;  %1147 = vmatpush3.bf16.msra.mxu1 %v1272_v8 }
  0x32   :  { %1148 = vmatprep.subr.bf16.mxu1 %v1274_v9 }
  0x34   :  { %1127 = vmatpush3.bf16.msra.mxu0 %v1275_v10 }
  0x35   :  { %1128 = vmatprep.subr.bf16.mxu0 %v1277_v11  ;;  %1149 = vmatpush3.bf16.msra.mxu1 %v1276_v12 }
  0x36   :  { %1150 = vmatprep.subr.bf16.mxu1 %v1278_v13 }
  0x38   :  { %1129 = vmatpush3.bf16.msra.mxu0 %v1279_v14  ;;  %v1065_v14 = vld [vmem:[%s1642_s6] ss:$0 sm:$0xff] }
  0x39   :  { %1130 = vmatprep.subr.bf16.mxu0 %v1281_v15  ;;  %1151 = vmatpush3.bf16.msra.mxu1 %v1280_v16 }
  0x3a   :  { %1152 = vmatprep.subr.bf16.mxu1 %v1282_v17 }
  0x3c   :  { %1131 = vmatpush3.bf16.msra.mxu0 %v1283_v18 }
  0x3d   :  { %1132 = vmatprep.subr.bf16.mxu0 %v1285_v19  ;;  %1153 = vmatpush3.bf16.msra.mxu1 %v1284_v20 }
  0x3e   :  { %1154 = vmatprep.subr.bf16.mxu1 %v1286_v21 }
  0x40   :  { %1133 = vmatpush3.bf16.msra.mxu0 %v1287_v22 }
  0x41   :  { %1155 = vmatpush3.bf16.msra.mxu1 %v1288_v23  ;;  %1180 = vmatprep.subr.bf16.mxu0 %v1306_v26 }
  0x42   :  { %1200 = vmatprep.subr.bf16.mxu1 %v1306_v26 }
  0x43   :  { %713 = vmatmul.mubr.bf16.vlgmr.msra.gmra.mxu0 %v77_v24 }
  0x44   :  { %753 = vmatmul.mubr.bf16.vlgmr.msra.gmra.mxu1 %v79_v25  ;;  %1181 = vmatpush3.bf16.msra.mxu0 %v1289_v27 }
  0x45   :  { %1182 = vmatprep.subr.bf16.mxu0 %v1306_v26  ;;  %1196 = vmatprep.mubr.msk.bf16.mxu0 %vm1307_vm0, %v1306_v26 }
  0x46   :  { %1216 = vmatprep.mubr.msk.bf16.mxu1 %vm1307_vm0, %v1306_v26  ;;  %1201 = vmatpush3.bf16.msra.mxu1 %v1297_v35 }
  0x47   :  { %1202 = vmatprep.subr.bf16.mxu1 %v1306_v26 }
  0x48   :  { %1183 = vmatpush3.bf16.msra.mxu0 %v1290_v28 }
  0x49   :  { %1184 = vmatprep.subr.bf16.mxu0 %v1306_v26 }
  0x4a   :  { %1203 = vmatpush3.bf16.msra.mxu1 %v1298_v36 }
  0x4b   :  { %1204 = vmatprep.subr.bf16.mxu1 %v1306_v26 }
  0x4c   :  { %1185 = vmatpush3.bf16.msra.mxu0 %v1291_v29 }
  0x4d   :  { %1186 = vmatprep.subr.bf16.mxu0 %v1306_v26 }
  0x4e   :  { %1205 = vmatpush3.bf16.msra.mxu1 %v1299_v37 }
  0x4f   :  { %1206 = vmatprep.subr.bf16.mxu1 %v1306_v26 }
  0x50   :  { %1187 = vmatpush3.bf16.msra.mxu0 %v1292_v30 }
  0x51   :  { %1188 = vmatprep.subr.bf16.mxu0 %v1306_v26 }
  0x52   :  { %1207 = vmatpush3.bf16.msra.mxu1 %v1300_v38 }
  0x53   :  { %1208 = vmatprep.subr.bf16.mxu1 %v1306_v26 }
  0x54   :  { %1189 = vmatpush3.bf16.msra.mxu0 %v1293_v31 }
  0x55   :  { %1190 = vmatprep.subr.bf16.mxu0 %v1306_v26 }
  0x56   :  { %1209 = vmatpush3.bf16.msra.mxu1 %v1301_v39 }
  0x57   :  { %1210 = vmatprep.subr.bf16.mxu1 %v1306_v26 }
  0x58   :  { %1191 = vmatpush3.bf16.msra.mxu0 %v1294_v32 }
  0x59   :  { %1192 = vmatprep.subr.bf16.mxu0 %v1306_v26 }
  0x5a   :  { %1211 = vmatpush3.bf16.msra.mxu1 %v1302_v40 }
  0x5b   :  { %1212 = vmatprep.subr.bf16.mxu1 %v1306_v26 }
  0x5c   :  { %1193 = vmatpush3.bf16.msra.mxu0 %v1295_v33 }
  0x5d   :  { %1194 = vmatprep.subr.bf16.mxu0 %v1306_v26 }
  0x5e   :  { %1213 = vmatpush3.bf16.msra.mxu1 %v1303_v4 }
  0x5f   :  { %1214 = vmatprep.subr.bf16.mxu1 %v1306_v26 }
  0x60   :  { %1195 = vmatpush3.bf16.msra.mxu0 %v1296_v34 }
  0x62   :  { %1215 = vmatpush3.bf16.msra.mxu1 %v1304_v5 }
  0xe3   :  { %v1090_v41 = vpop.f32.mrf.mxu0 }
  0xe4   :  { %v1112_v42 = vpop.f32.mrf.mxu1 }
  0xe5   :  { %v1091_v43 = vpop.f32.mrf.mxu0 }
  0xe6   :  { %v1113_v44 = vpop.f32.mrf.mxu1  ;;  %v1092_v49 = vadd.f32 %v1091_v43, %v1090_v41 }
  0xe7   :  { %v1093_v45 = vpop.f32.mrf.mxu0  ;;  %v1114_v52 = vadd.f32 %v1113_v44, %v1112_v42 }
  0xe8   :  { %v1115_v46 = vpop.f32.mrf.mxu1  ;;  %v635_v51 = vadd.f32 %v1092_v49, %v991_v50 }
  0xe9   :  { %v1094_v47 = vpop.f32.mrf.mxu0 }
  0xea   :  { %v1116_v48 = vpop.f32.mrf.mxu1  ;;  %v675_v56 = vadd.f32 %v1114_v52, %v635_v51 }
 0x103   :  { %v1134_v53 = vpop.f32.mrf.mxu0 }
 0x104   :  { %v1156_v54 = vpop.f32.mrf.mxu1 }
 0x105   :  { %v1135_v55 = vpop.f32.mrf.mxu0 }
 0x106   :  { %v1136_v57 = vadd.f32 %v1135_v55, %v1134_v53  ;;  %v1157_v58 = vpop.f32.mrf.mxu1 }
 0x107   :  { %v1137_v59 = vpop.f32.mrf.mxu0  ;;  %v1158_v61 = vadd.f32 %v1157_v58, %v1156_v54 }
 0x108   :  { %v715_v60 = vadd.f32 %v1136_v57, %v675_v56  ;;  %v1159_v62 = vpop.f32.mrf.mxu1 }
 0x109   :  { %v1138_v63 = vpop.f32.mrf.mxu0 }
 0x10a   :  { %v755_v0 = vadd.f32 %v1158_v61, %v715_v60  ;;  %v1160_v1 = vpop.f32.mrf.mxu1 }
 0x10c   :  { %v760_v2 = vmax.f32 %v755_v0, 0.0 }
 0x10e   :  { %v761_v3 = vpack.c.bf16 %v760_v2, %v760_v2 }
 0x110   :  { %1197 = vmatmul.mubr.bf16.vlgmr.msra.gmra.mxu0 %v761_v3 }
 0x1d0   :  { %v867_v7 = vpop.f32.mrf.mxu0 }
 0x1d1   :  { %v868_v8 = vadd.f32 %v1056_v6, %v867_v7 }
 0x1d2   :  { %v1198_v9 = vpop.f32.mrf.mxu0 }
 0x1d3   :  { %v873_v10 = vmax.f32 %v868_v8, 0.0 }
 0x1d4   :  { %v870_v11 = vpop.f32.mrf.mxu0 }
 0x1d5   :  { %v874_v12 = vpack.c.bf16 %v873_v10, %v873_v10 }
 0x1d6   :  { %v1199_v13 = vpop.f32.mrf.mxu0 }
 0x1d7   :  { %1217 = vmatmul.mubr.bf16.vlgmr.msra.gmra.mxu1 %v874_v12 }
 0x297   :  { %v980_v15 = vpop.f32.mrf.mxu1 }
 0x298   :  { %v981_v16 = vadd.f32 %v1065_v14, %v980_v15 }
 0x299   :  { %v1218_v17 = vpop.f32.mrf.mxu1 }
 0x29a   :  { %986 = vst [vmem:[%s1643_s7] sm:$0x3] %v981_v16 }
 0x29b   :  { %v983_v18 = vpop.f32.mrf.mxu1 }
 0x29d   :  { %v1219_v19 = vpop.f32.mrf.mxu1 }

</bundles_post_ra>
